<compile_context>
chip_gen: v5e
topology: v5e:2x2
jax: 0.10.0
libtpu: 0.0.40
codegen_flags: <defaults>
</compile_context>

<pallas_src>
import jax
import jax.numpy as jnp
from jax import lax
from jax.experimental import pallas as pl
from jax.experimental.pallas import tpu as pltpu


def _ten_hot_kernel(x_ref, out_ref):
    """Multi-hot encode one block of rows.

    x_ref  : (TR, K)  int32 token indices for TR rows, K slots per row.
    out_ref: (TR, V)  float32; out[r, v] = 1.0 iff v appears in x[r, :].
    """
    TR, V = out_ref.shape
    K = x_ref.shape[1]
    # Column index of every output element (lane-dense iota over the vocab).
    vocab = lax.broadcasted_iota(jnp.int32, (TR, V), 1)          # (TR, V)
    # K is small and static -> unrolled Python loop; each step is one
    # broadcast-compare + OR on the VPU (no scatter needed).
    hit = vocab == x_ref[:, 0:1]                                  # (TR, V) bool
    for k in range(1, K):
        hit = jnp.logical_or(hit, vocab == x_ref[:, k:k + 1])
    out_ref[...] = hit.astype(out_ref.dtype)


def ten_hot_encode(x, num_tokens, *, max_block_rows=512):
    """JAX wrapper matching TenHotEncodeLayer.forward (2-D or 3-D input)."""
    x = jnp.asarray(x)
    assert x.ndim in (2, 3), "input must be (N, K) or (N, T, K)"
    orig_shape = x.shape

    # Flatten the leading dims into one "rows" axis; the kernel is identical
    # for the 2-D and 3-D cases.
    x2 = x.reshape(-1, x.shape[-1]).astype(jnp.int32)             # (R, K)
    R, K = x2.shape

    # Row-block size: multiple of 8 (sublane), capped to keep the VMEM
    # working set small and leave room for double-buffering (v7x: 64 MiB).
    rows8 = pl.cdiv(R, 8) * 8
    block_rows = min(max_block_rows, rows8)
    Rp = pl.cdiv(R, block_rows) * block_rows
    if Rp != R:
        # Pad with index 0; padded rows are sliced off after the kernel.
        x2 = jnp.pad(x2, ((0, Rp - R), (0, 0)))

    out_padded = pl.pallas_call(
        _ten_hot_kernel,
        out_shape=jax.ShapeDtypeStruct((Rp, num_tokens), jnp.float32),
        grid_spec=pltpu.PrefetchScalarGridSpec(
            num_scalar_prefetch=0,
            grid=(Rp // block_rows,),
            in_specs=[pl.BlockSpec((block_rows, K), lambda i: (i, 0))],
            out_specs=pl.BlockSpec((block_rows, num_tokens), lambda i: (i, 0)),
        ),
        compiler_params=pltpu.CompilerParams(
            dimension_semantics=("parallel",)),
    )(x2)

    out = out_padded[:R]
    if x.ndim == 3:
        out = out.reshape(orig_shape[0], orig_shape[1], num_tokens)
    return out


def ten_hot_ref(x, num_tokens):
    """Pure-JAX reference of the same forward pass (for correctness check)."""
    x = jnp.asarray(x).astype(jnp.int32)
    oh = jax.nn.one_hot(x, num_tokens, dtype=jnp.float32)         # (..., K, V)
    return jnp.max(oh, axis=-2)                                   # (..., V)


if __name__ == "__main__":
    # Module config: num_tokens = 128 (lane-dense vocab), "ten-hot" K = 10.
    num_tokens = 128
    key = jax.random.PRNGKey(0)
    k2d, k3d = jax.random.split(key)

    # 2-D case: (N, K) = (4, 10)
    x2d = jax.random.randint(k2d, (4, 10), 0, num_tokens)
    # 3-D case: (N, T, K) = (2, 8, 10)
    x3d = jax.random.randint(k3d, (2, 8, 10), 0, num_tokens)

    out2d = jax.block_until_ready(ten_hot_encode(x2d, num_tokens))
    out3d = jax.block_until_ready(ten_hot_encode(x3d, num_tokens))

    ref2d = ten_hot_ref(x2d, num_tokens)
    ref3d = ten_hot_ref(x3d, num_tokens)

    assert out2d.shape == (4, num_tokens), out2d.shape
    assert out3d.shape == (2, 8, num_tokens), out3d.shape
    assert jnp.allclose(out2d, ref2d), (out2d, ref2d)
    assert jnp.allclose(out3d, ref3d), (out3d, ref3d)
    print("KERNEL_OK")
</pallas_src>

<mosaic_0001>
module attributes {stable_mosaic.version = 11 : i64} {
  func.func @_ten_hot_kernel(%arg0: i32, %arg1: memref<8x10xi32, #tpu.memory_space<vmem>>, %arg2: memref<8x128xf32, #tpu.memory_space<vmem>>) attributes {dimension_semantics = [#tpu.dimension_semantics<parallel>], iteration_bounds = array<i64: 1>, scalar_prefetch = 0 : i64, scratch_operands = 0 : i64, tpu.core_type = #tpu.core_type<tc>, window_params = [{transform_indices = @transform_0, window_bounds = array<i64: 8, 10>}, {transform_indices = @transform_1, window_bounds = array<i64: 8, 128>}]} {
    %0 = tpu.iota {dimensions = array<i32: 1>} : vector<8x128xi32>
    %c0 = arith.constant 0 : index
    %c0_0 = arith.constant 0 : index
    %1 = vector.load %arg1[%c0, %c0_0] : memref<8x10xi32, #tpu.memory_space<vmem>>, vector<8x1xi32>
    %2 = vector.broadcast %1 : vector<8x1xi32> to vector<8x128xi32>
    %3 = arith.cmpi eq, %0, %2 : vector<8x128xi32>
    %c0_1 = arith.constant 0 : index
    %c1 = arith.constant 1 : index
    %4 = vector.load %arg1[%c0_1, %c1] : memref<8x10xi32, #tpu.memory_space<vmem>>, vector<8x1xi32>
    %5 = vector.broadcast %4 : vector<8x1xi32> to vector<8x128xi32>
    %6 = arith.cmpi eq, %0, %5 : vector<8x128xi32>
    %7 = arith.ori %3, %6 : vector<8x128xi1>
    %c0_2 = arith.constant 0 : index
    %c2 = arith.constant 2 : index
    %8 = vector.load %arg1[%c0_2, %c2] : memref<8x10xi32, #tpu.memory_space<vmem>>, vector<8x1xi32>
    %9 = vector.broadcast %8 : vector<8x1xi32> to vector<8x128xi32>
    %10 = arith.cmpi eq, %0, %9 : vector<8x128xi32>
    %11 = arith.ori %7, %10 : vector<8x128xi1>
    %c0_3 = arith.constant 0 : index
    %c3 = arith.constant 3 : index
    %12 = vector.load %arg1[%c0_3, %c3] : memref<8x10xi32, #tpu.memory_space<vmem>>, vector<8x1xi32>
    %13 = vector.broadcast %12 : vector<8x1xi32> to vector<8x128xi32>
    %14 = arith.cmpi eq, %0, %13 : vector<8x128xi32>
    %15 = arith.ori %11, %14 : vector<8x128xi1>
    %c0_4 = arith.constant 0 : index
    %c4 = arith.constant 4 : index
    %16 = vector.load %arg1[%c0_4, %c4] : memref<8x10xi32, #tpu.memory_space<vmem>>, vector<8x1xi32>
    %17 = vector.broadcast %16 : vector<8x1xi32> to vector<8x128xi32>
    %18 = arith.cmpi eq, %0, %17 : vector<8x128xi32>
    %19 = arith.ori %15, %18 : vector<8x128xi1>
    %c0_5 = arith.constant 0 : index
    %c5 = arith.constant 5 : index
    %20 = vector.load %arg1[%c0_5, %c5] : memref<8x10xi32, #tpu.memory_space<vmem>>, vector<8x1xi32>
    %21 = vector.broadcast %20 : vector<8x1xi32> to vector<8x128xi32>
    %22 = arith.cmpi eq, %0, %21 : vector<8x128xi32>
    %23 = arith.ori %19, %22 : vector<8x128xi1>
    %c0_6 = arith.constant 0 : index
    %c6 = arith.constant 6 : index
    %24 = vector.load %arg1[%c0_6, %c6] : memref<8x10xi32, #tpu.memory_space<vmem>>, vector<8x1xi32>
    %25 = vector.broadcast %24 : vector<8x1xi32> to vector<8x128xi32>
    %26 = arith.cmpi eq, %0, %25 : vector<8x128xi32>
    %27 = arith.ori %23, %26 : vector<8x128xi1>
    %c0_7 = arith.constant 0 : index
    %c7 = arith.constant 7 : index
    %28 = vector.load %arg1[%c0_7, %c7] : memref<8x10xi32, #tpu.memory_space<vmem>>, vector<8x1xi32>
    %29 = vector.broadcast %28 : vector<8x1xi32> to vector<8x128xi32>
    %30 = arith.cmpi eq, %0, %29 : vector<8x128xi32>
    %31 = arith.ori %27, %30 : vector<8x128xi1>
    %c0_8 = arith.constant 0 : index
    %c8 = arith.constant 8 : index
    %32 = vector.load %arg1[%c0_8, %c8] : memref<8x10xi32, #tpu.memory_space<vmem>>, vector<8x1xi32>
    %33 = vector.broadcast %32 : vector<8x1xi32> to vector<8x128xi32>
    %34 = arith.cmpi eq, %0, %33 : vector<8x128xi32>
    %35 = arith.ori %31, %34 : vector<8x128xi1>
    %c0_9 = arith.constant 0 : index
    %c9 = arith.constant 9 : index
    %36 = vector.load %arg1[%c0_9, %c9] : memref<8x10xi32, #tpu.memory_space<vmem>>, vector<8x1xi32>
    %37 = vector.broadcast %36 : vector<8x1xi32> to vector<8x128xi32>
    %38 = arith.cmpi eq, %0, %37 : vector<8x128xi32>
    %39 = arith.ori %35, %38 : vector<8x128xi1>
    %40 = arith.extui %39 : vector<8x128xi1> to vector<8x128xi32>
    %41 = arith.sitofp %40 : vector<8x128xi32> to vector<8x128xf32>
    %c0_10 = arith.constant 0 : index
    %c0_11 = arith.constant 0 : index
    %42 = vector.load %arg2[%c0_10, %c0_11] : memref<8x128xf32, #tpu.memory_space<vmem>>, vector<8x128xf32>
    tpu.vector_store %arg2[%c0_10, %c0_11], %41 {strides = array<i32>} : memref<8x128xf32, #tpu.memory_space<vmem>>, vector<8x128xf32>,
    return
  }
  func.func @transform_0(%arg0: i32) -> (i32, i32) {
    %c0_i32 = arith.constant 0 : i32
    %c0_i32_0 = arith.constant 0 : i32
    return %arg0, %c0_i32 : i32, i32
  }
  func.func @transform_1(%arg0: i32) -> (i32, i32) {
    %c0_i32 = arith.constant 0 : i32
    %c0_i32_0 = arith.constant 0 : i32
    return %arg0, %c0_i32 : i32, i32
  }
}

</mosaic_0001>

<bundles_post_ra>
// kernel: tpu_custom_call.1
= control target key start
LH: loop header
LB: loop body
LE: loop exit
PB: predicated region body
PF: predicated region fallthrough
CT: control target
= control target key end

     0   :  { %6 = vsyncpa [#allocation3], 0  ;;  %s201_s0 = inlined_call_operand.hbm [shape: s32[8,10], index: 0, kind: input, shape index: {}]   ;;  %s202_s1 = inlined_call_operand.hbm [shape: f32[8,128], index: 1, kind: output, shape index: {}]  }
   0x1   :  { %7 = vsyncpa [#allocation4], 0  ;;  %s13_s8 = sshll.u32 %s201_s0, 4  ;;  %s172_s9 = smov [#allocation2]   ;;  %s14_s8 = int_to_ptr.hbm [resolvable:$true] %s13_s8 }
   0x2   :  { %s15_s10 = sshll.u32 %s172_s9, 4  ;;  %s16_s10 = int_to_ptr.vmem [resolvable:$true] %s15_s10 }
   0x3   :  { %18 = dma.hbm_to_vmem [thread:$0]  %s14_s8, 128, %s16_s10, [#allocation3]  }
   0x4   :  { %168 = dma.done.wait [#allocation3], 128  }
   0x5   :  { %169 = vsyncadd [#allocation3], 4294967168  ;;  %v173_v0 = vmov 2   ;;  %v174_v1 = vmov 0   ;;  %v175_v2 = vmov 4   ;;  %v25_v3 = vld [vmem:[#allocation2] sm:$0xff]  ;;  %v23_v14 = vlaneseq }
   0x6   :  { %111 = vset.pattern.permute.xlu1 %v173_v0  ;;  %109 = vset.pattern.permute.xlu0 %v174_v1  ;;  %v176_v4 = vmov 3   ;;  %v177_v5 = vmov 1   ;;  %v178_v6 = vmov 5   ;;  %v179_v7 = vmov 6   ;;  %s183_s0 = smov [#allocation5]   ;;  %s85_s14 = sshll.u32 %s202_s1, 4  ;;  %s86_s14 = int_to_ptr.hbm [resolvable:$true] %s85_s14 }
   0x7   :  { %113 = vset.pattern.permute.xlu2 %v175_v2  ;;  %36 = vperm.xlu1 %111, %v25_v3   ;;  %v180_v8 = vmov 8   ;;  %v181_v9 = vmov 7   ;;  %v182_v10 = vmov 9   ;;  %v24_v15 = vand.u32 127, %v23_v14  ;;  %s83_s11 = sshll.u32 %s183_s0, 4  ;;  %s84_s11 = int_to_ptr.vmem [resolvable:$true] %s83_s11 }
   0x8   :  { %27 = vperm.xlu0 %109, %v25_v3   ;;  %46 = vperm.xlu2 %113, %v25_v3   ;;  %v184_v23 = vmov 0.0  }
   0xf   :  { %112 = vset.pattern.permute.xlu1 %v176_v4 }
  0x10   :  { %110 = vset.pattern.permute.xlu0 %v177_v5  ;;  %41 = vperm.xlu1 %112, %v25_v3  }
  0x11   :  { %31 = vperm.xlu0 %110, %v25_v3   ;;  %114 = vset.pattern.permute.xlu2 %v178_v6 }
  0x12   :  { %51 = vperm.xlu2 %114, %v25_v3  }
  0x18   :  { %115 = vset.pattern.permute.xlu1 %v179_v7 }
  0x19   :  { %117 = vset.pattern.permute.xlu0 %v180_v8  ;;  %56 = vperm.xlu1 %115, %v25_v3  }
  0x1a   :  { %66 = vperm.xlu0 %117, %v25_v3   ;;  %116 = vset.pattern.permute.xlu2 %v181_v9 }
  0x1b   :  { %61 = vperm.xlu2 %116, %v25_v3  }
  0x21   :  { %118 = vset.pattern.permute.xlu1 %v182_v10 }
  0x22   :  { %119 = vset.pattern.permute.xlu0 %v182_v10  ;;  %71 = vperm.xlu1 %118, %v25_v3  }
  0x62   :  { %v47_v11 = vpop.permute.xlu2 %46 }
  0x63   :  { %vm48_vm7 = vcmp.eq.s32.totalorder %v24_v15, %v47_v11 }
  0x6c   :  { %v52_v16 = vpop.permute.xlu2 %51 }
  0x6d   :  { %vm53_vm9 = vcmp.eq.s32.totalorder %v24_v15, %v52_v16 }
  0x75   :  { %v62_v20 = vpop.permute.xlu2 %61 }
  0x76   :  { %vm63_vm13 = vcmp.eq.s32.totalorder %v24_v15, %v62_v20 }
  0x79   :  { %v37_v12 = vpop.permute.xlu1 %36 }
  0x7a   :  { %v28_v13 = vpop.permute.xlu0 %27  ;;  %vm38_vm2 = vcmp.eq.s32.totalorder %v24_v15, %v37_v12 }
  0x7b   :  { %vm29_vm0 = vcmp.eq.s32.totalorder %v24_v15, %v28_v13 }
  0x82   :  { %v42_v17 = vpop.permute.xlu1 %41 }
  0x83   :  { %v32_v18 = vpop.permute.xlu0 %31  ;;  %vm43_vm5 = vcmp.eq.s32.totalorder %v24_v15, %v42_v17 }
  0x84   :  { %vm33_vm1 = vcmp.eq.s32.totalorder %v24_v15, %v32_v18 }
  0x85   :  { %vm34_vm3 = vmor %vm29_vm0, %vm33_vm1 }
  0x86   :  { %vm39_vm4 = vmor %vm34_vm3, %vm38_vm2 }
  0x87   :  { %vm44_vm6 = vmor %vm39_vm4, %vm43_vm5 }
  0x88   :  { %vm49_vm8 = vmor %vm44_vm6, %vm48_vm7 }
  0x89   :  { %vm54_vm11 = vmor %vm49_vm8, %vm53_vm9 }
  0x8b   :  { %v57_v19 = vpop.permute.xlu1 %56 }
  0x8c   :  { %vm58_vm10 = vcmp.eq.s32.totalorder %v24_v15, %v57_v19  ;;  %v67_v21 = vpop.permute.xlu0 %66 }
  0x8d   :  { %vm59_vm12 = vmor %vm54_vm11, %vm58_vm10  ;;  %vm68_vm15 = vcmp.eq.s32.totalorder %v24_v15, %v67_v21 }
  0x8e   :  { %vm64_vm14 = vmor %vm59_vm12, %vm63_vm13 }
  0x8f   :  { %vm69_vm0 = vmor %vm64_vm14, %vm68_vm15 }
  0x94   :  { %v72_v22 = vpop.permute.xlu1 %71 }
  0x95   :  { %vm73_vm1 = vcmp.eq.s32.totalorder %v24_v15, %v72_v22 }
  0x96   :  { %vm74_vm2 = vmor %vm69_vm0, %vm73_vm1 }
  0x97   :  { %v95_v24 = vsel %vm74_vm2, 1.0, %v184_v23 }
  0x98   :  { %77 = vst [vmem:[#allocation5] sm:$0xff] %v95_v24 }
  0x99   :  { %88 = dma.vmem_to_hbm [thread:$0]  %s84_s11, 128, %s86_s14, [#allocation4]  }
  0x9a   :  { %170 = dma.done.wait [#allocation4], 128  }
  0x9b   :  { %171 = vsyncadd [#allocation4], 4294967168 }
  0x9c   :  { %93 = vsyncpa [#allocation3], 1 }
  0x9d   :  { %94 = vsyncpa [#allocation4], 1 }

</bundles_post_ra>
